<compile_context>
chip_gen: v6e
topology: v6e:2x2x1
jax: 0.10.0
libtpu: 0.0.40
codegen_flags: <defaults>
</compile_context>

<pallas_src>
import jax
import jax.numpy as jnp
from jax.experimental import pallas as pl
from jax.experimental.pallas import tpu as pltpu


# ----------------------------------------------------------------------------
# Tiling / padding helpers
# ----------------------------------------------------------------------------
_VMEM_WORKING_BUDGET = 24 * 1024 * 1024   # conservative across v5e/v6e/v7x


def _divisors_desc(n, multiple=1):
    return [d for d in range(n, 0, -1) if n % d == 0 and d % multiple == 0]


def _choose_tiles(S, B, D, x_itemsize, fixed_bytes, out_itemsize=4,
                  budget=_VMEM_WORKING_BUDGET):
    """Budget-aware (TS, TB) pick.

    B and S are assumed to be multiples of 8 (callers pad).  TB is a multiple
    of 8 (sublane granularity); TS divides S.  We maximize TS*TB (matmul M
    rows / DMA size per step) subject to the working-set byte budget.
    """
    def est(ts, tb):
        return (2 * ts * tb * D * x_itemsize     # x slab, double buffered
                + 2 * ts * tb * 4                # validity / lengths operand
                + 2 * tb * D * out_itemsize      # output tile, double buffered
                + tb * D * 4                     # f32 accumulator scratch
                + fixed_bytes)                   # grid-invariant operands

    best = None
    for tb in _divisors_desc(B, 8):
        for ts in _divisors_desc(S, 1):
            e = est(ts, tb)
            if e > budget:
                continue
            score = (ts * tb, tb)
            if best is None or score > best[0]:
                best = (score, ts, tb, e)
            break                                # largest ts that fits this tb
    if best is None:
        # Even the minimum tile exceeds the soft budget; take the smallest
        # tile and rely on the (raised) scoped-VMEM limit.
        ts, tb = 1, min(8, B)
        return ts, tb, est(ts, tb)
    _, ts, tb, e = best
    return ts, tb, e


def _vmem_limit(est_bytes):
    # est already counts double buffering; add headroom for compiler scratch.
    return int(min(max(est_bytes * 14 // 10 + (2 << 20), 8 << 20), 48 << 20))


def _compiler_params(est_bytes):
    # TODO(synk): on v7x, mark the batch axis CORE_PARALLEL (2 TensorCores)
    # and single-buffer the grid-invariant weights (pipeline_mode=Buffered(1)).
    return pltpu.CompilerParams(
        dimension_semantics=("parallel", "arbitrary"),
        vmem_limit_bytes=_vmem_limit(est_bytes),
    )


def _pad_to_multiple(a, axis, m, value=0):
    pad = (-a.shape[axis]) % m
    if pad == 0:
        return a
    widths = [(0, 0)] * a.ndim
    widths[axis] = (0, pad)
    return jnp.pad(a, widths, constant_values=value)


# ----------------------------------------------------------------------------
# 'sum' aggregation: out[b, :] = sum_{s < lengths[b]} x[s, b, :]
# grid = (B/TB, S/TS); seq axis is "arbitrary", accumulated in a VMEM scratch.
# ----------------------------------------------------------------------------
def _sum_kernel(len_ref, x_ref, o_ref, acc_ref):
    # len_ref: (TB, 1) int32 | x_ref: (TS, TB, D) | o_ref/acc_ref: (TB, D)
    s_idx = pl.program_id(1)
    TS, TB = x_ref.shape[0], x_ref.shape[1]

    @pl.when(s_idx == 0)
    def _():
        acc_ref[...] = jnp.zeros_like(acc_ref)

    x = x_ref[...].astype(jnp.float32)                               # (TS,TB,D)
    # Validity from lengths via a single iota compare per block.
    s_pos = (jax.lax.broadcasted_iota(jnp.int32, (TS, TB, 1), 0)
             + s_idx * TS)                                           # (TS,TB,1)
    lens = len_ref[...].reshape(1, TB, 1)                            # (1,TB,1)
    acc_ref[...] += jnp.sum(jnp.where(s_pos < lens, x, 0.0), axis=0)

    @pl.when(s_idx == pl.num_programs(1) - 1)
    def _():
        o_ref[...] = acc_ref[...].astype(o_ref.dtype)


def masked_sum(x_sbd, lengths):
    S, B, D = x_sbd.shape
    x_p = _pad_to_multiple(_pad_to_multiple(x_sbd, 1, 8), 0, 8)      # pad B, S
    Sp, Bp, _ = x_p.shape
    lens = _pad_to_multiple(lengths.astype(jnp.int32).reshape(B, 1), 0, 8)

    TS, TB, est = _choose_tiles(Sp, Bp, D, x_p.dtype.itemsize,
                                fixed_bytes=2 * Bp * 4,
                                out_itemsize=x_p.dtype.itemsize)
    out = pl.pallas_call(
        _sum_kernel,
        out_shape=jax.ShapeDtypeStruct((Bp, D), x_sbd.dtype),
        grid=(Bp // TB, Sp // TS),
        in_specs=[
            pl.BlockSpec((TB, 1), lambda b, s: (b, 0)),              # lengths
            pl.BlockSpec((TS, TB, D), lambda b, s: (s, b, 0)),       # x (S,B,D)
        ],
        out_specs=pl.BlockSpec((TB, D), lambda b, s: (b, 0)),        # lane-dense
        scratch_shapes=[pltpu.VMEM((TB, D), jnp.float32)],
        compiler_params=_compiler_params(est),
    )(lens, x_p)
    return out[:B]


# ----------------------------------------------------------------------------
# 'gated' aggregation (GatedAggregation), per batch row b:
#   gate = Linear(D,D) -> ReLU -> Linear(D,1)
#   m    = sigmoid(gate) * valid        (== sigmoid(masked_fill(-inf)))
#   v    = Linear(D,D) -> ReLU -> Linear(D,D)
#   out  = sum_s m[s] * v[s, :]
#
# Sequence steps are merged into the matmul M dimension: each grid step runs
# three (TS*TB, D)-row matmuls.  aux rows: [b1g, b1n, w2g_row, b2n, b2g, 0..].
# ----------------------------------------------------------------------------
def _gated_kernel(x_ref, valid_ref, w1g_ref, w1n_ref, w2n_ref, aux_ref,
                  o_ref, acc_ref):
    s_idx = pl.program_id(1)
    TS, TB, D = x_ref.shape

    @pl.when(s_idx == 0)
    def _():
        acc_ref[...] = jnp.zeros_like(acc_ref)

    aux = aux_ref[...]                   # (8, D) float32
    b1g = aux[0:1, :]
    b1n = aux[1:2, :]
    w2g = aux[2:3, :]                    # Linear(D,1).weight row
    b2n = aux[3:4, :]
    b2g = aux[4:5, 0:1]                  # (1, 1)

    # Merge sequence steps into the matmul M dim (layout-free: TB % 8 == 0).
    xs = x_ref[...].reshape(TS * TB, D)

    hg = jnp.maximum(jnp.dot(xs, w1g_ref[...],
                             preferred_element_type=jnp.float32) + b1g, 0.0)
    hn = jnp.maximum(jnp.dot(xs, w1n_ref[...],
                             preferred_element_type=jnp.float32) + b1n, 0.0)
    # Gate head has a single output unit -> lane reduce (XLU, overlaps MXU).
    gate = jnp.sum(hg * w2g, axis=-1, keepdims=True) + b2g          # (TS*TB,1)
    v = jnp.dot(hn.astype(w2n_ref.dtype), w2n_ref[...],
                preferred_element_type=jnp.float32) + b2n           # (TS*TB,D)

    # Masked sigmoid weights (== masked_fill(-inf) + sigmoid; gate is finite).
    m = jax.nn.sigmoid(gate).reshape(TS, TB, 1) * valid_ref[...]    # (TS,TB,1)
    acc_ref[...] += jnp.sum(m * v.reshape(TS, TB, D), axis=0)

    @pl.when(s_idx == pl.num_programs(1) - 1)
    def _():
        o_ref[...] = acc_ref[...].astype(o_ref.dtype)


def gated_aggregation(x_sbd, mask, w1g, w1n, w2n, aux):
    S, B, D = x_sbd.shape
    # Cast x once at the boundary (bf16 weights => bf16 x, halves HBM bytes).
    x_m = x_sbd.astype(w1g.dtype)
    x_p = _pad_to_multiple(_pad_to_multiple(x_m, 1, 8), 0, 8)
    Sp, Bp, _ = x_p.shape
    # validity in (S, B, 1) layout: lane-broadcast friendly, padded rows -> 0.
    valid = jnp.logical_not(mask).astype(jnp.float32).T[:, :, None]
    valid = _pad_to_multiple(_pad_to_multiple(valid, 1, 8), 0, 8)

    w_item = w1g.dtype.itemsize
    fixed = 2 * (3 * D * D * w_item + 8 * D * 4)      # double-buffered weights
    TS, TB, est = _choose_tiles(Sp, Bp, D, x_p.dtype.itemsize,
                                fixed_bytes=fixed, out_itemsize=4)
    out = pl.pallas_call(
        _gated_kernel,
        out_shape=jax.ShapeDtypeStruct((Bp, D), jnp.float32),
        grid=(Bp // TB, Sp // TS),
        in_specs=[
            pl.BlockSpec((TS, TB, D), lambda b, s: (s, b, 0)),       # x (S,B,D)
            pl.BlockSpec((TS, TB, 1), lambda b, s: (s, b, 0)),       # validity
            pl.BlockSpec((D, D), lambda b, s: (0, 0)),               # w1g
            pl.BlockSpec((D, D), lambda b, s: (0, 0)),               # w1n
            pl.BlockSpec((D, D), lambda b, s: (0, 0)),               # w2n
            pl.BlockSpec((8, D), lambda b, s: (0, 0)),               # aux pack
        ],
        out_specs=pl.BlockSpec((TB, D), lambda b, s: (b, 0)),        # lane-dense
        scratch_shapes=[pltpu.VMEM((TB, D), jnp.float32)],
        compiler_params=_compiler_params(est),
    )(x_p, valid, w1g, w1n, w2n, aux)
    return out[:B]


# ----------------------------------------------------------------------------
# Aggregator wrapper (mirrors the PyTorch module)
# ----------------------------------------------------------------------------
class Aggregator:
    def __init__(self, embed_size, aggregation_type="sum", key=None,
                 matmul_dtype=jnp.float32):
        # matmul_dtype=jnp.bfloat16 is recommended on v6e/v7x (halves HBM/VMEM
        # bytes for x and weights); elementwise math / accumulation is f32.
        self.aggregation = aggregation_type
        self.embed_size = embed_size
        if self.aggregation == "gated":
            D = embed_size
            key = jax.random.PRNGKey(0) if key is None else key
            ks = jax.random.split(key, 8)
            s = 0.1
            # weights stored as (in, out) so the kernel does x @ W directly
            self.params = {
                "w1g": jax.random.normal(ks[0], (D, D), jnp.float32) * s,
                "b1g": jax.random.normal(ks[1], (D,), jnp.float32) * s,
                "w2g": jax.random.normal(ks[2], (D,), jnp.float32) * s,
                "b2g": jax.random.normal(ks[3], (), jnp.float32) * s,
                "w1n": jax.random.normal(ks[4], (D, D), jnp.float32) * s,
                "b1n": jax.random.normal(ks[5], (D,), jnp.float32) * s,
                "w2n": jax.random.normal(ks[6], (D, D), jnp.float32) * s,
                "b2n": jax.random.normal(ks[7], (D,), jnp.float32) * s,
            }
            p = self.params
            # Keep the two first-layer weights separate (no (D,2D) fusion) so
            # the kernel never lane-slices at a non-128-aligned boundary.
            self._w1g = p["w1g"].astype(matmul_dtype)
            self._w1n = p["w1n"].astype(matmul_dtype)
            self._w2n = p["w2n"].astype(matmul_dtype)
            aux = jnp.zeros((8, D), jnp.float32)
            aux = aux.at[0].set(p["b1g"])
            aux = aux.at[1].set(p["b1n"])
            aux = aux.at[2].set(p["w2g"])
            aux = aux.at[3].set(p["b2n"])
            aux = aux.at[4].set(jnp.full((D,), p["b2g"]))
            self._aux = aux
        # TODO(synk): 'gru' and 'sum-and-map' aggregation paths not implemented.

    def __call__(self, x_sbd, lengths, mask):
        if self.aggregation == "first":
            return x_sbd[0, :, :]
        elif self.aggregation == "sum":
            return masked_sum(x_sbd, lengths)
        elif self.aggregation == "gated":
            return gated_aggregation(x_sbd, mask, self._w1g, self._w1n,
                                     self._w2n, self._aux)
        else:
            raise ValueError("Final aggregation not defined!")


if __name__ == "__main__":
    key = jax.random.PRNGKey(0)
    S, B, D = 8, 2, 32
    kx, kp = jax.random.split(key)

    x = jax.random.normal(kx, (S, B, D), jnp.float32)          # (seq, batch, embed)
    lengths = jnp.array([8, 5], jnp.int32)                     # valid lengths
    mask = jnp.arange(S)[None, :] >= lengths[:, None]          # (B, S) True == padded

    x_bsd = jnp.transpose(x, (1, 0, 2))                        # reference only

    # --- 'first' aggregation ---
    agg_f = Aggregator(D, "first")
    out_f = jax.block_until_ready(agg_f(x, lengths, mask))
    assert out_f.shape == (B, D)
    assert jnp.allclose(out_f, x[0]), "first aggregation mismatch"

    # --- 'sum' aggregation ---
    agg_sum = Aggregator(D, "sum")
    out_sum = jax.block_until_ready(agg_sum(x, lengths, mask))
    ref_sum = jnp.sum(jnp.where(mask[:, :, None], 0.0, x_bsd), axis=1)
    assert out_sum.shape == (B, D)
    assert jnp.allclose(out_sum, ref_sum, atol=1e-5), "sum aggregation mismatch"

    # --- 'gated' aggregation ---
    agg_g = Aggregator(D, "gated", key=kp)
    out_g = jax.block_until_ready(agg_g(x, lengths, mask))
    p = agg_g.params
    hg = jax.nn.relu(x_bsd @ p["w1g"] + p["b1g"])
    gate = jnp.sum(hg * p["w2g"], axis=-1, keepdims=True) + p["b2g"]
    gate = jnp.where(mask[:, :, None], -jnp.inf, gate)
    m = jax.nn.sigmoid(gate)
    hn = jax.nn.relu(x_bsd @ p["w1n"] + p["b1n"])
    v = hn @ p["w2n"] + p["b2n"]
    ref_g = jnp.einsum("bs,bsd->bd", m[:, :, 0], v)
    assert out_g.shape == (B, D)
    assert jnp.allclose(out_g, ref_g, atol=1e-4), "gated aggregation mismatch"

    print("KERNEL_OK")
</pallas_src>

<mosaic_0001>
module attributes {stable_mosaic.version = 11 : i64} {
  func.func @_sum_kernel(%arg0: i32, %arg1: i32, %arg2: memref<8x1xi32, #tpu.memory_space<vmem>>, %arg3: memref<8x8x32xf32, #tpu.memory_space<vmem>>, %arg4: memref<8x32xf32, #tpu.memory_space<vmem>>, %arg5: memref<8x32xf32, #tpu.memory_space<vmem>>) attributes {dimension_semantics = [#tpu.dimension_semantics<parallel>, #tpu.dimension_semantics<arbitrary>], iteration_bounds = array<i64: 1, 1>, scalar_prefetch = 0 : i64, scratch_operands = 1 : i64, tpu.core_type = #tpu.core_type<tc>, window_params = [{transform_indices = @transform_0, window_bounds = array<i64: 8, 1>}, {transform_indices = @transform_1, window_bounds = array<i64: 8, 8, 32>}, {transform_indices = @transform_2, window_bounds = array<i64: 8, 32>}]} {
    %c0_i32 = arith.constant 0 : i32
    %0 = arith.cmpi eq, %arg1, %c0_i32 : i32
    %1 = arith.extui %0 : i1 to i32
    %c0_i32_0 = arith.constant 0 : i32
    %2 = arith.cmpi ne, %1, %c0_i32_0 : i32
    scf.if %2 {
      %cst_12 = arith.constant 0.000000e+00 : f32
      %23 = vector.broadcast %cst_12 : f32 to vector<8x32xf32>
      %c0_13 = arith.constant 0 : index
      %c0_14 = arith.constant 0 : index
      %24 = vector.load %arg5[%c0_13, %c0_14] : memref<8x32xf32, #tpu.memory_space<vmem>>, vector<8x32xf32>
      tpu.vector_store %arg5[%c0_13, %c0_14], %23 {strides = array<i32>} : memref<8x32xf32, #tpu.memory_space<vmem>>, vector<8x32xf32>,
    } else {
    }
    %c0 = arith.constant 0 : index
    %c0_1 = arith.constant 0 : index
    %c0_2 = arith.constant 0 : index
    %3 = vector.load %arg3[%c0, %c0_1, %c0_2] : memref<8x8x32xf32, #tpu.memory_space<vmem>>, vector<8x8x32xf32>
    %4 = tpu.iota {dimensions = array<i32: 0>} : vector<8x8x1xi32>
    %c8_i32 = arith.constant 8 : i32
    %5 = arith.muli %arg1, %c8_i32 : i32
    %6 = vector.broadcast %5 : i32 to vector<8x8x1xi32>
    %7 = arith.addi %4, %6 : vector<8x8x1xi32>
    %c0_3 = arith.constant 0 : index
    %c0_4 = arith.constant 0 : index
    %8 = vector.load %arg2[%c0_3, %c0_4] : memref<8x1xi32, #tpu.memory_space<vmem>>, vector<8x1xi32>
    %9 = vector.shape_cast %8 : vector<8x1xi32> to vector<1x8x1xi32>
    %c0_5 = arith.constant 0 : index
    %c0_6 = arith.constant 0 : index
    %10 = vector.load %arg5[%c0_5, %c0_6] : memref<8x32xf32, #tpu.memory_space<vmem>>, vector<8x32xf32>
    %11 = vector.broadcast %9 : vector<1x8x1xi32> to vector<8x8x1xi32>
    %12 = arith.cmpi slt, %7, %11 : vector<8x8x1xi32>
    %cst = arith.constant 0.000000e+00 : f32
    %13 = vector.shape_cast %12 : vector<8x8x1xi1> to vector<8x8x1xi1>
    %14 = vector.broadcast %13 : vector<8x8x1xi1> to vector<8x8x32xi1>
    %15 = vector.broadcast %cst : f32 to vector<8x8x32xf32>
    %16 = arith.select %14, %3, %15 : vector<8x8x32xi1>, vector<8x8x32xf32>
    %cst_7 = arith.constant dense<0.000000e+00> : vector<8x32xf32>
    %17 = vector.multi_reduction <add>, %16, %cst_7 [0] : vector<8x8x32xf32> to vector<8x32xf32>
    %18 = arith.addf %10, %17 : vector<8x32xf32>
    %c0_8 = arith.constant 0 : index
    %c0_9 = arith.constant 0 : index
    %19 = vector.load %arg5[%c0_8, %c0_9] : memref<8x32xf32, #tpu.memory_space<vmem>>, vector<8x32xf32>
    tpu.vector_store %arg5[%c0_8, %c0_9], %18 {strides = array<i32>} : memref<8x32xf32, #tpu.memory_space<vmem>>, vector<8x32xf32>,
    %c0_i32_10 = arith.constant 0 : i32
    %20 = arith.cmpi eq, %arg1, %c0_i32_10 : i32
    %21 = arith.extui %20 : i1 to i32
    %c0_i32_11 = arith.constant 0 : i32
    %22 = arith.cmpi ne, %21, %c0_i32_11 : i32
    scf.if %22 {
      %c0_12 = arith.constant 0 : index
      %c0_13 = arith.constant 0 : index
      %23 = vector.load %arg5[%c0_12, %c0_13] : memref<8x32xf32, #tpu.memory_space<vmem>>, vector<8x32xf32>
      %c0_14 = arith.constant 0 : index
      %c0_15 = arith.constant 0 : index
      %24 = vector.load %arg4[%c0_14, %c0_15] : memref<8x32xf32, #tpu.memory_space<vmem>>, vector<8x32xf32>
      tpu.vector_store %arg4[%c0_14, %c0_15], %23 {strides = array<i32>} : memref<8x32xf32, #tpu.memory_space<vmem>>, vector<8x32xf32>,
    } else {
    }
    return
  }
  func.func @transform_0(%arg0: i32, %arg1: i32) -> (i32, i32) {
    %c0_i32 = arith.constant 0 : i32
    %c0_i32_0 = arith.constant 0 : i32
    return %arg0, %c0_i32 : i32, i32
  }
  func.func @transform_1(%arg0: i32, %arg1: i32) -> (i32, i32, i32) {
    %c0_i32 = arith.constant 0 : i32
    %c0_i32_0 = arith.constant 0 : i32
    return %arg1, %arg0, %c0_i32 : i32, i32, i32
  }
  func.func @transform_2(%arg0: i32, %arg1: i32) -> (i32, i32) {
    %c0_i32 = arith.constant 0 : i32
    %c0_i32_0 = arith.constant 0 : i32
    return %arg0, %c0_i32 : i32, i32
  }
}

</mosaic_0001>

<bundles_post_ra>
// kernel: tpu_custom_call.1
= control target key start
LH: loop header
LB: loop body
LE: loop exit
PB: predicated region body
PF: predicated region fallthrough
CT: control target
= control target key end

     0   :  { %7 = vsyncpa [#allocation4], 0  ;;  %s246_s0 = inlined_call_operand.vmem [shape: s32[8,1], index: 0, kind: input, shape index: {}]   ;;  %s247_s1 = inlined_call_operand.hbm [shape: f32[8,8,32], index: 1, kind: input, shape index: {}]   ;;  %s248_s2 = inlined_call_operand.hbm [shape: f32[8,32], index: 2, kind: output, shape index: {}]  }
   0x1   :  { %8 = vsyncpa [#allocation5], 0  ;;  %s205_s9 = smov [#allocation3]  }
   0x2   :  { %s16_s10 = sshll.u32 %s205_s9, 4  ;;  %s17_s10 = int_to_ptr.vmem [resolvable:$true] %s16_s10 }
   0x3   :  { %s169_s11 = scalar_lea.vmem %s17_s10, 1024  ;;  %p174_p1 = scmp.lt.s32.totalorder %s17_s10, %s17_s10 }
   0x4   :  { %p170_p0 = scmp.ne.s32.totalorder %s17_s10, %s169_s11  ;;  %p175_p2 = scmp.lt.s32.totalorder %s169_s11, %s169_s11 }
   0x6   :  { %p176_p3 = por %p175_p2, %p174_p1 }
   0x8   :  { %p177_p4 = pnand %p176_p3, %p170_p0 }
   0xa   :  { %180 = shalt.err (!%p177_p4)
}
   0xb   :  { %s206_s12 = smov 128   ;;  %s207_s13 = smov 8  }
   0xc   :  { %22 = dma.hbm_to_vmem [thread:$0]  %s247_s1, 1024, %s17_s10, [#allocation4], %s206_s12, %s206_s12, %s207_s13  }
   0xd   :  { %201 = dma.done.wait [#allocation4], 1024  }
   0xe   :  { %202 = vsyncadd [#allocation4], 4294966272  ;;  %v208_v0 = vmov 0   ;;  %v49_v1 = vld [vmem:[%s246_s0] sm:$0xff]  ;;  %vm30_vm8 = vcmask 261120   ;;  %v209_v10 = vmov 0.0  }
   0xf   :  { %160 = vset.pattern.permute.xlu1 %v208_v0  ;;  %159 = vset.pattern.permute.xlu0 %v208_v0  ;;  %vm147_vm0 = vcmp.gt.s32.totalorder %v49_v1, 2  ;;  %vm145_vm1 = vcmp.gt.s32.totalorder %v49_v1, 0  ;;  %vm148_vm2 = vcmp.gt.s32.totalorder %v49_v1, 3  ;;  %vm146_vm3 = vcmp.gt.s32.totalorder %v49_v1, 1  ;;  %31 = vst.msk [vmem:[#allocation2] sm:$0xff] %vm30_vm8, %v209_v10  ;;  %v32_v13 = vld [vmem:[#allocation3] sm:$0xff] }
  0x10   :  { %v61_v2 = vsel %vm147_vm0, 1, %v208_v0  ;;  %v59_v3 = vsel %vm145_vm1, 1, %v208_v0  ;;  %v62_v4 = vsel %vm148_vm2, 1, %v208_v0  ;;  %v60_v5 = vsel %vm146_vm3, 1, %v208_v0  ;;  %v34_v14 = vld [vmem:[#allocation3 + $0x10] sm:$0xff]  ;;  %v33_v15 = vld [vmem:[#allocation3 + $0x8] sm:$0xff] }
  0x11   :  { %74 = vperm.xlu1 %160, %v61_v2   ;;  %68 = vperm.xlu0 %159, %v59_v3   ;;  %vm150_vm4 = vcmp.gt.s32.totalorder %v49_v1, 5  ;;  %vm149_vm5 = vcmp.gt.s32.totalorder %v49_v1, 4  ;;  %vm152_vm6 = vcmp.gt.s32.totalorder %v49_v1, 7  ;;  %vm151_vm7 = vcmp.gt.s32.totalorder %v49_v1, 6  ;;  %v35_v19 = vld [vmem:[#allocation3 + $0x18] sm:$0xff]  ;;  %v36_v24 = vld [vmem:[#allocation3 + $0x20] sm:$0xff] }
  0x12   :  { %v64_v6 = vsel %vm150_vm4, 1, %v208_v0  ;;  %v63_v7 = vsel %vm149_vm5, 1, %v208_v0  ;;  %v66_v8 = vsel %vm152_vm6, 1, %v208_v0  ;;  %v65_v9 = vsel %vm151_vm7, 1, %v208_v0  ;;  %v37_v30 = vld [vmem:[#allocation3 + $0x28] sm:$0xff]  ;;  %v38_v34 = vld [vmem:[#allocation3 + $0x30] sm:$0xff] }
  0x13   :  { %v39_v40 = vld [vmem:[#allocation3 + $0x38] sm:$0xff]  ;;  %s210_s0 = smov [#allocation6]  }
  0x14   :  { %s136_s1 = sshll.u32 %s210_s0, 4  ;;  %s137_s1 = int_to_ptr.vmem [resolvable:$true] %s136_s1 }
  0x15   :  { %77 = vperm.xlu1 %160, %v62_v4   ;;  %71 = vperm.xlu0 %159, %v60_v5   ;;  %s181_s18 = scalar_lea.vmem %s137_s1, 128  ;;  %p186_p6 = scmp.lt.s32.totalorder %s137_s1, %s137_s1 }
  0x16   :  { %v50_v49 = vld [vmem:[#allocation2] sm:$0xff]  ;;  %p182_p5 = scmp.ne.s32.totalorder %s137_s1, %s181_s18  ;;  %p187_p7 = scmp.lt.s32.totalorder %s181_s18, %s181_s18 }
  0x18   :  { %p188_p8 = por %p187_p7, %p186_p6 }
  0x19   :  { %83 = vperm.xlu1 %160, %v64_v6   ;;  %80 = vperm.xlu0 %159, %v63_v7  }
  0x1a   :  { %p189_p9 = pnand %p188_p8, %p182_p5 }
  0x1d   :  { %89 = vperm.xlu1 %160, %v66_v8   ;;  %86 = vperm.xlu0 %159, %v65_v9  }
  0x8c   :  { %v75_v11 = vpop.permute.xlu1 %74  ;;  %v69_v12 = vpop.permute.xlu0 %68 }
  0x8d   :  { %vm91_vm9 = vcmp.eq.s32.totalorder %v69_v12, 1  ;;  %vm93_vm10 = vcmp.eq.s32.totalorder %v75_v11, 1 }
  0x8e   :  { %v99_v16 = vsel %vm91_vm9, %v32_v13, 0.0  ;;  %v101_v20 = vsel %vm93_vm10, %v34_v14, 0.0 }
  0x8f   :  { %v108_v22 = vsel %vm30_vm8, %v99_v16, 0.0  ;;  %v111_v29 = vsel %vm30_vm8, %v101_v20, 0.0 }
  0x90   :  { %v78_v17 = vpop.permute.xlu1 %77  ;;  %v72_v18 = vpop.permute.xlu0 %71 }
  0x91   :  { %vm94_vm11 = vcmp.eq.s32.totalorder %v78_v17, 1  ;;  %vm92_vm12 = vcmp.eq.s32.totalorder %v72_v18, 1 }
  0x92   :  { %v100_v21 = vsel %vm92_vm12, %v33_v15, 0.0  ;;  %v102_v25 = vsel %vm94_vm11, %v35_v19, 0.0 }
  0x93   :  { %v109_v23 = vsel %vm30_vm8, %v100_v21, 0.0  ;;  %v113_v33 = vsel %vm30_vm8, %v102_v25, 0.0 }
  0x94   :  { %v110_v26 = vadd.f32 %v109_v23, %v108_v22  ;;  %v84_v27 = vpop.permute.xlu1 %83  ;;  %v81_v28 = vpop.permute.xlu0 %80 }
  0x95   :  { %vm96_vm13 = vcmp.eq.s32.totalorder %v84_v27, 1  ;;  %vm95_vm14 = vcmp.eq.s32.totalorder %v81_v28, 1 }
  0x96   :  { %v112_v31 = vadd.f32 %v111_v29, %v110_v26  ;;  %v103_v32 = vsel %vm95_vm14, %v36_v24, 0.0  ;;  %v104_v35 = vsel %vm96_vm13, %v37_v30, 0.0 }
  0x97   :  { %v115_v39 = vsel %vm30_vm8, %v103_v32, 0.0  ;;  %v117_v43 = vsel %vm30_vm8, %v104_v35, 0.0 }
  0x98   :  { %v114_v36 = vadd.f32 %v113_v33, %v112_v31  ;;  %v90_v37 = vpop.permute.xlu1 %89  ;;  %v87_v38 = vpop.permute.xlu0 %86 }
  0x99   :  { %vm98_vm15 = vcmp.eq.s32.totalorder %v90_v37, 1  ;;  %vm97_vm0 = vcmp.eq.s32.totalorder %v87_v38, 1 }
  0x9a   :  { %v116_v41 = vadd.f32 %v115_v39, %v114_v36  ;;  %v105_v42 = vsel %vm97_vm0, %v38_v34, 0.0  ;;  %v106_v44 = vsel %vm98_vm15, %v39_v40, 0.0 }
  0x9b   :  { %v119_v46 = vsel %vm30_vm8, %v105_v42, 0.0  ;;  %v121_v48 = vsel %vm30_vm8, %v106_v44, 0.0 }
  0x9c   :  { %v118_v45 = vadd.f32 %v117_v43, %v116_v41 }
  0x9e   :  { %v120_v47 = vadd.f32 %v119_v46, %v118_v45 }
  0xa0   :  { %v122_v50 = vadd.f32 %v121_v48, %v120_v47 }
  0xa2   :  { %v123_v51 = vadd.f32 %v122_v50, %v50_v49 }
  0xa4   :  { %124 = vst.msk [vmem:[#allocation2] sm:$0xff] %vm30_vm8, %v123_v51 }
  0xab   :  { %v128_v52 = vld [vmem:[#allocation2] sm:$0xff] }
  0xac   :  { %129 = vst.msk [vmem:[#allocation6] sm:$0xff] %vm30_vm8, %v128_v52 }
  0xad   :  { %192 = shalt.err (!%p189_p9)
}
  0xae   :  { %139 = dma.vmem_to_hbm [thread:$0]  %s137_s1, 128, %s248_s2, [#allocation5]  }
  0xaf   :  { %203 = dma.done.wait [#allocation5], 128  }
  0xb0   :  { %204 = vsyncadd [#allocation5], 4294967168 }
  0xb1   :  { %143 = vsyncpa [#allocation4], 1 }
  0xb2   :  { %144 = vsyncpa [#allocation5], 1 }

</bundles_post_ra>
